<compile_context>
chip_gen: v7x
topology: tpu7x:2x2x1
jax: 0.10.0
libtpu: 0.0.40
codegen_flags: <defaults>
</compile_context>

<pallas_src>
import functools

import jax
import jax.numpy as jnp
from jax.experimental import pallas as pl
from jax.experimental.pallas import tpu as pltpu

BN_EPS = 1e-5


def _round_up(n, m):
    return ((n + m - 1) // m) * m


# ----------------------------------------------------------------------------- kernel
def ae_forward_kernel(x_ref, w1_ref, w2_ref, w34_ref, w5_ref, w6_ref, b_ref,
                      out_ref, *, d_in):
    # Natural "batch on sublanes" layout: activations are (batch_tile, features).
    # All dots accumulate in f32 on the MXU; bias-add / ReLU run in f32 on the VPU.
    cdt = w1_ref.dtype
    x = x_ref[...].astype(cdt)                                        # in-kernel bf16 cast
    h = jnp.dot(x, w1_ref[...], preferred_element_type=jnp.float32)
    h = jnp.maximum(h + b_ref[0:1, 0:128], 0.0)                       # ReLU (Dropout = id)
    h = jnp.dot(h.astype(cdt), w2_ref[...], preferred_element_type=jnp.float32)
    h = jnp.maximum(h + b_ref[1:2, 0:64], 0.0)
    # encoder Linear(64,emb) -> BatchNorm1d(eval) -> decoder Linear(emb,64), pre-folded:
    h = jnp.dot(h.astype(cdt), w34_ref[...], preferred_element_type=jnp.float32)
    h = jnp.maximum(h + b_ref[2:3, 0:64], 0.0)
    h = jnp.dot(h.astype(cdt), w5_ref[...], preferred_element_type=jnp.float32)
    h = jnp.maximum(h + b_ref[3:4, 0:128], 0.0)
    y = jnp.dot(h.astype(cdt), w6_ref[...], preferred_element_type=jnp.float32)
    y = y + b_ref[4:5, 0:d_in]
    out_ref[...] = y.astype(out_ref.dtype)


# ----------------------------------------------------------------------------- host-side param prep
def prepare_params(p, *, weight_dtype=jnp.float32):
    """Fold w3 -> BN(eval) -> w4 into W34/b34 (exact, all-linear, done in f32), cast
    weights to the MXU dtype, and pack the five biases into one (5, W) f32 slab."""
    s = p["bn_gamma"] * jax.lax.rsqrt(p["bn_var"] + BN_EPS)       # (1, emb)
    t = p["bn_beta"] - p["bn_mean"] * s                           # (1, emb)
    w34 = (p["w3"] * s) @ p["w4"]                                 # (64, 64)
    b34 = (p["b3"] * s + t) @ p["w4"] + p["b4"]                   # (1, 64)

    d_in = p["w1"].shape[0]
    wb = max(128, d_in)

    def row(b):
        b = jnp.asarray(b, jnp.float32).reshape(1, -1)
        return jnp.pad(b, ((0, 0), (0, wb - b.shape[1])))

    bias_slab = jnp.concatenate(
        [row(p["b1"]), row(p["b2"]), row(b34), row(p["b5"]), row(p["b6"])], axis=0)

    def w(a):
        return jnp.asarray(a, weight_dtype)

    return dict(w1=w(p["w1"]), w2=w(p["w2"]), w34=w(w34), w5=w(p["w5"]),
                w6=w(p["w6"]), bias=bias_slab)


# ----------------------------------------------------------------------------- wrapper
def ae_forward(x, params, *, batch_tile=None, use_bf16=True):
    """x: (B, input_shape) float32.  params: raw dict from init_params (eval mode)."""
    B, D_in = x.shape

    if batch_tile is None:
        # Target ~2048-row tiles (multiple of 256 for the MXU N dim) to amortize the
        # ~0.35us per-grid-step cost, but cap at ceil(B/2) (rounded up) so the grid
        # stays >= 2 for medium/large batches and both v7x TensorCores get work.
        batch_tile = max(256, min(2048, _round_up(pl.cdiv(B, 2), 256)))
    else:
        batch_tile = _round_up(batch_tile, 128)
    # Never make the tile (much) bigger than the batch itself; sublane multiple of 8.
    batch_tile = max(8, min(batch_tile, _round_up(B, 8)))

    grid = (pl.cdiv(B, batch_tile),)   # ragged last tile handled by Pallas partial blocks

    weight_dtype = jnp.bfloat16 if use_bf16 else jnp.float32
    prep = prepare_params(params, weight_dtype=weight_dtype)
    ordered = [prep["w1"], prep["w2"], prep["w34"], prep["w5"], prep["w6"], prep["bias"]]

    x_spec = pl.BlockSpec((batch_tile, D_in), lambda i: (i, 0))
    out_spec = pl.BlockSpec((batch_tile, D_in), lambda i: (i, 0))
    # Parameters are tiny: replicate the full array to every grid step (fetched once).
    param_specs = [pl.BlockSpec(p.shape, lambda i: (0, 0)) for p in ordered]

    flops = 2 * B * (D_in * 128 + 128 * 64 + 64 * 64 + 64 * 128 + 128 * D_in)
    param_bytes = sum(int(p.size) * p.dtype.itemsize for p in ordered)
    bytes_accessed = int(2 * B * D_in * x.dtype.itemsize + param_bytes)

    # VMEM budget: double-buffered I/O blocks + f32 intermediates + params, with headroom.
    lane_d = max(D_in, 128)
    need = (2 * 2 * batch_tile * lane_d * 4                      # in + out blocks, 2x buffered
            + 2 * batch_tile * (128 + 64 + 64 + 128 + lane_d) * 4  # live f32 intermediates
            + 2 * param_bytes + (2 << 20))
    vmem_limit = int(min(48 << 20, max(32 << 20, need)))

    y = pl.pallas_call(
        functools.partial(ae_forward_kernel, d_in=D_in),
        out_shape=jax.ShapeDtypeStruct((B, D_in), x.dtype),
        grid=grid,
        in_specs=[x_spec] + param_specs,
        out_specs=out_spec,
        compiler_params=pltpu.CompilerParams(
            dimension_semantics=("parallel",),
            vmem_limit_bytes=vmem_limit),
        cost_estimate=pl.CostEstimate(
            flops=flops, transcendentals=0, bytes_accessed=bytes_accessed),
    )(x, *ordered)
    return y


# ----------------------------------------------------------------------------- init + reference
def _linear_init(key, fan_in, fan_out):
    """PyTorch nn.Linear default init: U(-1/sqrt(fan_in), 1/sqrt(fan_in)).
    W stored as (fan_in, fan_out); bias as (1, fan_out)."""
    kw, kb = jax.random.split(key)
    bound = 1.0 / jnp.sqrt(jnp.float32(fan_in))
    w = jax.random.uniform(kw, (fan_in, fan_out), jnp.float32, -bound, bound)
    b = jax.random.uniform(kb, (1, fan_out), jnp.float32, -bound, bound)
    return w, b


def init_params(key, input_shape, embedding_size):
    keys = jax.random.split(key, 6)
    w1, b1 = _linear_init(keys[0], input_shape, 128)
    w2, b2 = _linear_init(keys[1], 128, 64)
    w3, b3 = _linear_init(keys[2], 64, embedding_size)
    w4, b4 = _linear_init(keys[3], embedding_size, 64)
    w5, b5 = _linear_init(keys[4], 64, 128)
    w6, b6 = _linear_init(keys[5], 128, input_shape)
    # BatchNorm1d defaults: weight=1, bias=0, running_mean=0, running_var=1
    return dict(
        w1=w1, b1=b1, w2=w2, b2=b2, w3=w3, b3=b3,
        bn_gamma=jnp.ones((1, embedding_size), jnp.float32),
        bn_beta=jnp.zeros((1, embedding_size), jnp.float32),
        bn_mean=jnp.zeros((1, embedding_size), jnp.float32),
        bn_var=jnp.ones((1, embedding_size), jnp.float32),
        w4=w4, b4=b4, w5=w5, b5=b5, w6=w6, b6=b6,
    )


def ae_forward_ref(x, p):
    """Pure-JAX reference (eval mode, unfused) for correctness checking."""
    h = jnp.maximum(x @ p["w1"] + p["b1"], 0.0)
    h = jnp.maximum(h @ p["w2"] + p["b2"], 0.0)
    z = h @ p["w3"] + p["b3"]
    z = (z - p["bn_mean"]) * jax.lax.rsqrt(p["bn_var"] + BN_EPS) * p["bn_gamma"] + p["bn_beta"]
    h = jnp.maximum(z @ p["w4"] + p["b4"], 0.0)
    h = jnp.maximum(h @ p["w5"] + p["b5"], 0.0)
    return h @ p["w6"] + p["b6"]


# ----------------------------------------------------------------------------- test
if __name__ == "__main__":
    INPUT_SHAPE = 32
    EMBEDDING_SIZE = 8

    key = jax.random.PRNGKey(0)
    k_x, k_x2, k_p, k_bn = jax.random.split(key, 4)
    params = init_params(k_p, INPUT_SHAPE, EMBEDDING_SIZE)

    # Non-trivial BN running statistics so the w3->BN->w4 fold is actually exercised.
    kg, kb, km, kv = jax.random.split(k_bn, 4)
    params["bn_gamma"] = jax.random.uniform(kg, (1, EMBEDDING_SIZE), jnp.float32, 0.5, 1.5)
    params["bn_beta"] = 0.1 * jax.random.normal(kb, (1, EMBEDDING_SIZE), jnp.float32)
    params["bn_mean"] = 0.1 * jax.random.normal(km, (1, EMBEDDING_SIZE), jnp.float32)
    params["bn_var"] = jax.random.uniform(kv, (1, EMBEDDING_SIZE), jnp.float32, 0.5, 2.0)

    # --- small batch (single partial tile) ---
    x_small = jax.random.normal(k_x, (8, INPUT_SHAPE), jnp.float32)
    ref_small = ae_forward_ref(x_small, params)

    out_f32 = jax.block_until_ready(ae_forward(x_small, params, use_bf16=False))
    assert out_f32.shape == (8, INPUT_SHAPE)
    assert jnp.allclose(out_f32, ref_small, atol=1e-3, rtol=1e-3), "f32 mismatch (B=8)"

    out_bf16 = jax.block_until_ready(ae_forward(x_small, params))
    assert out_bf16.shape == (8, INPUT_SHAPE)
    assert jnp.allclose(out_bf16, ref_small, atol=5e-2, rtol=5e-2), "bf16 mismatch (B=8)"

    # --- larger ragged batch (grid >= 2, partial last tile, no host-side padding) ---
    x_big = jax.random.normal(k_x2, (300, INPUT_SHAPE), jnp.float32)
    ref_big = ae_forward_ref(x_big, params)

    out_big = jax.block_until_ready(ae_forward(x_big, params, use_bf16=False))
    assert out_big.shape == (300, INPUT_SHAPE)
    assert jnp.allclose(out_big, ref_big, atol=1e-3, rtol=1e-3), "f32 mismatch (B=300)"

    out_big_bf16 = jax.block_until_ready(ae_forward(x_big, params))
    assert jnp.allclose(out_big_bf16, ref_big, atol=1e-1, rtol=1e-1), "bf16 mismatch (B=300)"

    print("KERNEL_OK")
</pallas_src>

<mosaic_0001>
module attributes {stable_mosaic.version = 11 : i64} {
  func.func @ae_forward_kernel(%arg0: i32, %arg1: memref<8x32xf32, #tpu.memory_space<vmem>>, %arg2: memref<32x128xf32, #tpu.memory_space<vmem>>, %arg3: memref<128x64xf32, #tpu.memory_space<vmem>>, %arg4: memref<64x64xf32, #tpu.memory_space<vmem>>, %arg5: memref<64x128xf32, #tpu.memory_space<vmem>>, %arg6: memref<128x32xf32, #tpu.memory_space<vmem>>, %arg7: memref<5x128xf32, #tpu.memory_space<vmem>>, %arg8: memref<8x32xf32, #tpu.memory_space<vmem>>) attributes {dimension_semantics = [#tpu.dimension_semantics<parallel>], iteration_bounds = array<i64: 1>, scalar_prefetch = 0 : i64, scratch_operands = 0 : i64, tpu.core_type = #tpu.core_type<tc>, window_params = [{transform_indices = @transform_0, window_bounds = array<i64: 8, 32>}, {pipeline_mode = #tpu.pipeline_mode<synchronous>, transform_indices = @transform_1, window_bounds = array<i64: 32, 128>}, {pipeline_mode = #tpu.pipeline_mode<synchronous>, transform_indices = @transform_2, window_bounds = array<i64: 128, 64>}, {pipeline_mode = #tpu.pipeline_mode<synchronous>, transform_indices = @transform_3, window_bounds = array<i64: 64, 64>}, {pipeline_mode = #tpu.pipeline_mode<synchronous>, transform_indices = @transform_4, window_bounds = array<i64: 64, 128>}, {pipeline_mode = #tpu.pipeline_mode<synchronous>, transform_indices = @transform_5, window_bounds = array<i64: 128, 32>}, {pipeline_mode = #tpu.pipeline_mode<synchronous>, transform_indices = @transform_6, window_bounds = array<i64: 5, 128>}, {transform_indices = @transform_7, window_bounds = array<i64: 8, 32>}]} {
    %c0 = arith.constant 0 : index
    %c0_0 = arith.constant 0 : index
    %0 = vector.load %arg1[%c0, %c0_0] : memref<8x32xf32, #tpu.memory_space<vmem>>, vector<8x32xf32>
    %c0_1 = arith.constant 0 : index
    %c0_2 = arith.constant 0 : index
    %1 = vector.load %arg2[%c0_1, %c0_2] : memref<32x128xf32, #tpu.memory_space<vmem>>, vector<32x128xf32>
    %cst = arith.constant dense<0.000000e+00> : vector<8x128xf32>
    %2 = tpu.matmul %0, %1, %cst {dimension_numbers = #tpu.dot_dimension_numbers<[1], [0], [0], [1], [0, 0, 1, 1], [], []>} : vector<8x32xf32>, vector<32x128xf32>, vector<8x128xf32> -> vector<8x128xf32>
    %c0_3 = arith.constant 0 : index
    %c0_4 = arith.constant 0 : index
    %3 = vector.load %arg7[%c0_3, %c0_4] : memref<5x128xf32, #tpu.memory_space<vmem>>, vector<1x128xf32>
    %4 = vector.broadcast %3 : vector<1x128xf32> to vector<8x128xf32>
    %5 = arith.addf %2, %4 : vector<8x128xf32>
    %cst_5 = arith.constant 0.000000e+00 : f32
    %6 = vector.broadcast %cst_5 : f32 to vector<8x128xf32>
    %7 = arith.maximumf %5, %6 : vector<8x128xf32>
    %c0_6 = arith.constant 0 : index
    %c0_7 = arith.constant 0 : index
    %8 = vector.load %arg3[%c0_6, %c0_7] : memref<128x64xf32, #tpu.memory_space<vmem>>, vector<128x64xf32>
    %cst_8 = arith.constant dense<0.000000e+00> : vector<8x64xf32>
    %9 = tpu.matmul %7, %8, %cst_8 {dimension_numbers = #tpu.dot_dimension_numbers<[1], [0], [0], [1], [0, 0, 1, 1], [], []>} : vector<8x128xf32>, vector<128x64xf32>, vector<8x64xf32> -> vector<8x64xf32>
    %c1 = arith.constant 1 : index
    %c0_9 = arith.constant 0 : index
    %10 = vector.load %arg7[%c1, %c0_9] : memref<5x128xf32, #tpu.memory_space<vmem>>, vector<1x64xf32>
    %11 = vector.broadcast %10 : vector<1x64xf32> to vector<8x64xf32>
    %12 = arith.addf %9, %11 : vector<8x64xf32>
    %cst_10 = arith.constant 0.000000e+00 : f32
    %13 = vector.broadcast %cst_10 : f32 to vector<8x64xf32>
    %14 = arith.maximumf %12, %13 : vector<8x64xf32>
    %c0_11 = arith.constant 0 : index
    %c0_12 = arith.constant 0 : index
    %15 = vector.load %arg4[%c0_11, %c0_12] : memref<64x64xf32, #tpu.memory_space<vmem>>, vector<64x64xf32>
    %cst_13 = arith.constant dense<0.000000e+00> : vector<8x64xf32>
    %16 = tpu.matmul %14, %15, %cst_13 {dimension_numbers = #tpu.dot_dimension_numbers<[1], [0], [0], [1], [0, 0, 1, 1], [], []>} : vector<8x64xf32>, vector<64x64xf32>, vector<8x64xf32> -> vector<8x64xf32>
    %c2 = arith.constant 2 : index
    %c0_14 = arith.constant 0 : index
    %17 = vector.load %arg7[%c2, %c0_14] : memref<5x128xf32, #tpu.memory_space<vmem>>, vector<1x64xf32>
    %18 = vector.broadcast %17 : vector<1x64xf32> to vector<8x64xf32>
    %19 = arith.addf %16, %18 : vector<8x64xf32>
    %cst_15 = arith.constant 0.000000e+00 : f32
    %20 = vector.broadcast %cst_15 : f32 to vector<8x64xf32>
    %21 = arith.maximumf %19, %20 : vector<8x64xf32>
    %c0_16 = arith.constant 0 : index
    %c0_17 = arith.constant 0 : index
    %22 = vector.load %arg5[%c0_16, %c0_17] : memref<64x128xf32, #tpu.memory_space<vmem>>, vector<64x128xf32>
    %cst_18 = arith.constant dense<0.000000e+00> : vector<8x128xf32>
    %23 = tpu.matmul %21, %22, %cst_18 {dimension_numbers = #tpu.dot_dimension_numbers<[1], [0], [0], [1], [0, 0, 1, 1], [], []>} : vector<8x64xf32>, vector<64x128xf32>, vector<8x128xf32> -> vector<8x128xf32>
    %c3 = arith.constant 3 : index
    %c0_19 = arith.constant 0 : index
    %24 = vector.load %arg7[%c3, %c0_19] : memref<5x128xf32, #tpu.memory_space<vmem>>, vector<1x128xf32>
    %25 = vector.broadcast %24 : vector<1x128xf32> to vector<8x128xf32>
    %26 = arith.addf %23, %25 : vector<8x128xf32>
    %cst_20 = arith.constant 0.000000e+00 : f32
    %27 = vector.broadcast %cst_20 : f32 to vector<8x128xf32>
    %28 = arith.maximumf %26, %27 : vector<8x128xf32>
    %c0_21 = arith.constant 0 : index
    %c0_22 = arith.constant 0 : index
    %29 = vector.load %arg6[%c0_21, %c0_22] : memref<128x32xf32, #tpu.memory_space<vmem>>, vector<128x32xf32>
    %cst_23 = arith.constant dense<0.000000e+00> : vector<8x32xf32>
    %30 = tpu.matmul %28, %29, %cst_23 {dimension_numbers = #tpu.dot_dimension_numbers<[1], [0], [0], [1], [0, 0, 1, 1], [], []>} : vector<8x128xf32>, vector<128x32xf32>, vector<8x32xf32> -> vector<8x32xf32>
    %c4 = arith.constant 4 : index
    %c0_24 = arith.constant 0 : index
    %31 = vector.load %arg7[%c4, %c0_24] : memref<5x128xf32, #tpu.memory_space<vmem>>, vector<1x32xf32>
    %32 = vector.broadcast %31 : vector<1x32xf32> to vector<8x32xf32>
    %33 = arith.addf %30, %32 : vector<8x32xf32>
    %c0_25 = arith.constant 0 : index
    %c0_26 = arith.constant 0 : index
    %34 = vector.load %arg8[%c0_25, %c0_26] : memref<8x32xf32, #tpu.memory_space<vmem>>, vector<8x32xf32>
    tpu.vector_store %arg8[%c0_25, %c0_26], %33 {strides = array<i32>} : memref<8x32xf32, #tpu.memory_space<vmem>>, vector<8x32xf32>,
    return
  }
  func.func @transform_0(%arg0: i32) -> (i32, i32) {
    %c0_i32 = arith.constant 0 : i32
    %c0_i32_0 = arith.constant 0 : i32
    return %arg0, %c0_i32 : i32, i32
  }
  func.func @transform_1(%arg0: i32) -> (i32, i32) {
    %c0_i32 = arith.constant 0 : i32
    %c0_i32_0 = arith.constant 0 : i32
    %c0_i32_1 = arith.constant 0 : i32
    return %c0_i32, %c0_i32_0 : i32, i32
  }
  func.func @transform_2(%arg0: i32) -> (i32, i32) {
    %c0_i32 = arith.constant 0 : i32
    %c0_i32_0 = arith.constant 0 : i32
    %c0_i32_1 = arith.constant 0 : i32
    return %c0_i32, %c0_i32_0 : i32, i32
  }
  func.func @transform_3(%arg0: i32) -> (i32, i32) {
    %c0_i32 = arith.constant 0 : i32
    %c0_i32_0 = arith.constant 0 : i32
    %c0_i32_1 = arith.constant 0 : i32
    return %c0_i32, %c0_i32_0 : i32, i32
  }
  func.func @transform_4(%arg0: i32) -> (i32, i32) {
    %c0_i32 = arith.constant 0 : i32
    %c0_i32_0 = arith.constant 0 : i32
    %c0_i32_1 = arith.constant 0 : i32
    return %c0_i32, %c0_i32_0 : i32, i32
  }
  func.func @transform_5(%arg0: i32) -> (i32, i32) {
    %c0_i32 = arith.constant 0 : i32
    %c0_i32_0 = arith.constant 0 : i32
    %c0_i32_1 = arith.constant 0 : i32
    return %c0_i32, %c0_i32_0 : i32, i32
  }
  func.func @transform_6(%arg0: i32) -> (i32, i32) {
    %c0_i32 = arith.constant 0 : i32
    %c0_i32_0 = arith.constant 0 : i32
    %c0_i32_1 = arith.constant 0 : i32
    return %c0_i32, %c0_i32_0 : i32, i32
  }
  func.func @transform_7(%arg0: i32) -> (i32, i32) {
    %c0_i32 = arith.constant 0 : i32
    %c0_i32_0 = arith.constant 0 : i32
    return %arg0, %c0_i32 : i32, i32
  }
}

</mosaic_0001>

<bundles_post_ra>
// kernel: tpu_custom_call.1
= control target key start
LH: loop header
LB: loop body
LE: loop exit
PB: predicated region body
PF: predicated region fallthrough
CT: control target
= control target key end

     0   :  { %v775_v3 = vmov 0.0|0.0   ;;  %vm776_vm0 = vmmov 0   ;;  %v777_v6 = vmov 0.0   ;;  %s1045_s0 = inlined_call_operand.vmem [shape: f32[8,32], index: 0, kind: input, shape index: {}]   ;;  %s1046_s1 = inlined_call_operand.vmem [shape: f32[32,128], index: 1, kind: input, shape index: {}]   ;;  %s1047_s2 = inlined_call_operand.vmem [shape: f32[128,64], index: 2, kind: input, shape index: {}]   ;;  %s1048_s3 = inlined_call_operand.vmem [shape: f32[64,64], index: 3, kind: input, shape index: {}]   ;;  %s1049_s4 = inlined_call_operand.vmem [shape: f32[64,128], index: 4, kind: input, shape index: {}]   ;;  %s1050_s5 = inlined_call_operand.vmem [shape: f32[128,32], index: 5, kind: input, shape index: {}]   ;;  %s1051_s6 = inlined_call_operand.vmem [shape: f32[5,128], index: 6, kind: input, shape index: {}]   ;;  %s1052_s7 = inlined_call_operand.hbm [shape: f32[8,32], index: 7, kind: output, shape index: {}]  }
   0x1   :  { %v28_v0 = vld [vmem:[%s1046_s1] sm:$0xff]  ;;  %v29_v1 = vld [vmem:[%s1046_s1 + $0x8] sm:$0xff]  ;;  %v30_v2 = vld [vmem:[%s1046_s1 + $0x10] sm:$0xff]  ;;  %669 = vmatprep.subr.bf16.mxu0 %v775_v3  ;;  %558 = vmatprep.mubr.msk.f32.mxu0 %vm776_vm0, %v777_v6 }
   0x2   :  { %v670_v4 = vpack.c.bf16 %v29_v1, %v28_v0  ;;  %v31_v5 = vld [vmem:[%s1046_s1 + $0x18] sm:$0xff]  ;;  %v112_v7 = vld [vmem:[%s1047_s2] sm:$0xff]  ;;  %675 = vmatprep.subr.bf16.mxu1 %v775_v3  ;;  %v113_v8 = vld [vmem:[%s1047_s2 + $0x8] sm:$0xff]  ;;  %593 = vmatprep.mubr.msk.f32.mxu1 %vm776_vm0, %v777_v6 }
   0x3   :  { %v114_v9 = vld [vmem:[%s1047_s2 + $0x10] sm:$0xff]  ;;  %v115_v10 = vld [vmem:[%s1047_s2 + $0x18] sm:$0xff]  ;;  %v673_v11 = vpack.c.bf16 %v31_v5, %v30_v2  ;;  %v676_v12 = vpack.c.bf16 %v113_v8, %v112_v7  ;;  %v116_v14 = vld [vmem:[%s1047_s2 + $0x20] sm:$0xff] }
   0x4   :  { %671 = vmatpush3.bf16.msra.mxu0 %v670_v4  ;;  %v679_v13 = vpack.c.bf16 %v115_v10, %v114_v9  ;;  %v117_v15 = vld [vmem:[%s1047_s2 + $0x28] sm:$0xff] }
   0x5   :  { %672 = vmatprep.subr.bf16.mxu0 %v775_v3  ;;  %677 = vmatpush3.bf16.msra.mxu1 %v676_v12 }
   0x6   :  { %678 = vmatprep.subr.bf16.mxu1 %v775_v3 }
   0x7   :  { %12 = vsyncpa [#allocation3], 0  ;;  %v27_v16 = vld [vmem:[%s1045_s0] sm:$0xff]  ;;  %vm37_vm1 = vcmask 261120   ;;  %v682_v17 = vpack.c.bf16 %v117_v15, %v116_v14  ;;  %v118_v18 = vld [vmem:[%s1047_s2 + $0x30] sm:$0xff]  ;;  %vm217_vm2 = vcmask 523264  }
   0x8   :  { %674 = vmatpush3.bf16.msra.mxu0 %v673_v11  ;;  %v119_v19 = vld [vmem:[%s1047_s2 + $0x38] sm:$0xff]  ;;  %v120_v21 = vld [vmem:[%s1047_s2 + $0x40] sm:$0xff]  ;;  %v121_v22 = vld [vmem:[%s1047_s2 + $0x48] sm:$0xff]  ;;  %s778_s10 = smov [#allocation2]  }
   0x9   :  { %699 = vmatprep.subr.bf16.mxu0 %v775_v3  ;;  %680 = vmatpush3.bf16.msra.mxu1 %v679_v13  ;;  %v685_v20 = vpack.c.bf16 %v119_v19, %v118_v18  ;;  %v688_v23 = vpack.c.bf16 %v121_v22, %v120_v21  ;;  %v122_v24 = vld [vmem:[%s1047_s2 + $0x50] sm:$0xff]  ;;  %v123_v25 = vld [vmem:[%s1047_s2 + $0x58] sm:$0xff]  ;;  %v124_v27 = vld [vmem:[%s1047_s2 + $0x60] sm:$0xff]  ;;  %s477_s11 = sshll.u32 %s778_s10, 4  ;;  %s478_s11 = int_to_ptr.vmem [resolvable:$true] %s477_s11 }
   0xa   :  { %681 = vmatprep.subr.bf16.mxu1 %v775_v3  ;;  %v691_v26 = vpack.c.bf16 %v123_v25, %v122_v24  ;;  %v125_v28 = vld [vmem:[%s1047_s2 + $0x68] sm:$0xff]  ;;  %v126_v30 = vld [vmem:[%s1047_s2 + $0x70] sm:$0xff]  ;;  %v127_v31 = vld [vmem:[%s1047_s2 + $0x78] sm:$0xff]  ;;  %p756_p1 = scmp.lt.s32.totalorder %s478_s11, %s478_s11 }
   0xb   :  { %559 = vmatmul.mubr.msk.f32.vlgmr.msra.gmra.mrb[0].mxu0 %vm37_vm1, %v27_v16  ;;  %v694_v29 = vpack.c.bf16 %v125_v28, %v124_v27  ;;  %v697_v32 = vpack.c.bf16 %v127_v31, %v126_v30  ;;  %v204_v33 = vld [vmem:[%s1048_s3] sm:$0xff]  ;;  %v205_v34 = vld [vmem:[%s1048_s3 + $0x8] sm:$0xff]  ;;  %v206_v35 = vld [vmem:[%s1048_s3 + $0x10] sm:$0xff] }
   0xc   :  { %612 = vmatprep.mubr.msk.f32.mxu0 %vm776_vm0, %v777_v6  ;;  %v700_v36 = vpack.c.bf16 %v205_v34, %v204_v33  ;;  %v207_v37 = vld [vmem:[%s1048_s3 + $0x18] sm:$0xff]  ;;  %v208_v39 = vld [vmem:[%s1048_s3 + $0x20] sm:$0xff]  ;;  %v209_v40 = vld [vmem:[%s1048_s3 + $0x28] sm:$0xff] }
   0xd   :  { %683 = vmatpush3.bf16.msra.mxu1 %v682_v17  ;;  %v703_v38 = vpack.c.bf16 %v207_v37, %v206_v35  ;;  %v706_v41 = vpack.c.bf16 %v209_v40, %v208_v39  ;;  %v485_v42 = vld [vmem:[%s1051_s6] ss:$0 sm:$0xff]  ;;  %v210_v47 = vld [vmem:[%s1048_s3 + $0x30] sm:$0xff]  ;;  %v211_v48 = vld [vmem:[%s1048_s3 + $0x38] sm:$0xff] }
   0xe   :  { %684 = vmatprep.subr.bf16.mxu1 %v775_v3  ;;  %701 = vmatpush3.bf16.msra.mxu0 %v700_v36  ;;  %v709_v49 = vpack.c.bf16 %v211_v48, %v210_v47  ;;  %v487_v50 = vld [vmem:[%s1051_s6 + $0x1] ss:$0 sm:$0xff]  ;;  %v293_v52 = vld [vmem:[%s1049_s4 + $0x8] sm:$0xff]  ;;  %v294_v58 = vld [vmem:[%s1049_s4 + $0x10] sm:$0xff] }
   0xf   :  { %702 = vmatprep.subr.bf16.mxu0 %v775_v3  ;;  %v292_v51 = vld [vmem:[%s1049_s4] sm:$0xff]  ;;  %v295_v59 = vld [vmem:[%s1049_s4 + $0x18] sm:$0xff]  ;;  %v297_v62 = vld [vmem:[%s1049_s4 + $0x28] sm:$0xff] }
  0x10   :  { %v712_v56 = vpack.c.bf16 %v293_v52, %v292_v51  ;;  %v715_v60 = vpack.c.bf16 %v295_v59, %v294_v58  ;;  %v296_v61 = vld [vmem:[%s1049_s4 + $0x20] sm:$0xff]  ;;  %v298_v0 = vld [vmem:[%s1049_s4 + $0x30] sm:$0xff]  ;;  %v299_v1 = vld [vmem:[%s1049_s4 + $0x38] sm:$0xff] }
  0x11   :  { %686 = vmatpush3.bf16.msra.mxu1 %v685_v20  ;;  %v718_v63 = vpack.c.bf16 %v297_v62, %v296_v61  ;;  %v721_v2 = vpack.c.bf16 %v299_v1, %v298_v0  ;;  %v379_v4 = vld [vmem:[%s1050_s5] sm:$0xff]  ;;  %v380_v5 = vld [vmem:[%s1050_s5 + $0x8] sm:$0xff]  ;;  %v382_v8 = vld [vmem:[%s1050_s5 + $0x18] sm:$0xff] }
  0x12   :  { %687 = vmatprep.subr.bf16.mxu1 %v775_v3  ;;  %704 = vmatpush3.bf16.msra.mxu0 %v703_v38  ;;  %v724_v7 = vpack.c.bf16 %v380_v5, %v379_v4  ;;  %v383_v10 = vld [vmem:[%s1050_s5 + $0x20] sm:$0xff]  ;;  %v384_v11 = vld [vmem:[%s1050_s5 + $0x28] sm:$0xff]  ;;  %v385_v13 = vld [vmem:[%s1050_s5 + $0x30] sm:$0xff] }
  0x13   :  { %705 = vmatprep.subr.bf16.mxu0 %v775_v3  ;;  %v730_v12 = vpack.c.bf16 %v384_v11, %v383_v10  ;;  %v386_v14 = vld [vmem:[%s1050_s5 + $0x38] sm:$0xff]  ;;  %v387_v16 = vld [vmem:[%s1050_s5 + $0x40] sm:$0xff]  ;;  %v388_v17 = vld [vmem:[%s1050_s5 + $0x48] sm:$0xff] }
  0x14   :  { %v733_v15 = vpack.c.bf16 %v386_v14, %v385_v13  ;;  %v736_v18 = vpack.c.bf16 %v388_v17, %v387_v16  ;;  %v389_v19 = vld [vmem:[%s1050_s5 + $0x50] sm:$0xff]  ;;  %v390_v20 = vld [vmem:[%s1050_s5 + $0x58] sm:$0xff]  ;;  %v391_v22 = vld [vmem:[%s1050_s5 + $0x60] sm:$0xff] }
  0x15   :  { %689 = vmatpush3.bf16.msra.mxu1 %v688_v23  ;;  %v739_v21 = vpack.c.bf16 %v390_v20, %v389_v19  ;;  %v392_v23 = vld [vmem:[%s1050_s5 + $0x68] sm:$0xff]  ;;  %v488_v25 = vld [vmem:[%s1051_s6 + $0x2] ss:$0 sm:$0xff]  ;;  %v393_v30 = vld [vmem:[%s1050_s5 + $0x70] sm:$0xff] }
  0x16   :  { %690 = vmatprep.subr.bf16.mxu1 %v775_v3  ;;  %707 = vmatpush3.bf16.msra.mxu0 %v706_v41  ;;  %v742_v24 = vpack.c.bf16 %v392_v23, %v391_v22  ;;  %v394_v31 = vld [vmem:[%s1050_s5 + $0x78] sm:$0xff]  ;;  %v492_v37 = vld [vmem:[%s1051_s6 + $0x4] ss:$0 sm:$0xff] }
  0x17   :  { %708 = vmatprep.subr.bf16.mxu0 %v775_v3 }
  0x19   :  { %692 = vmatpush3.bf16.msra.mxu1 %v691_v26 }
  0x1a   :  { %693 = vmatprep.subr.bf16.mxu1 %v775_v3  ;;  %710 = vmatpush3.bf16.msra.mxu0 %v709_v49 }
  0x1b   :  { %711 = vmatprep.subr.bf16.mxu0 %v775_v3 }
  0x1d   :  { %695 = vmatpush3.bf16.msra.mxu1 %v694_v29 }
  0x1e   :  { %696 = vmatprep.subr.bf16.mxu1 %v775_v3 }
  0x21   :  { %698 = vmatpush3.bf16.msra.mxu1 %v697_v32  ;;  %v745_v32 = vpack.c.bf16 %v394_v31, %v393_v30 }
  0x22   :  { %723 = vmatprep.subr.bf16.mxu1 %v775_v3 }
  0xde   :  { %v107_v43 = vpop.f32.mrb[0].mxu0 }
  0xdf   :  { %v108_v44 = vadd.f32 %v485_v42, %v107_v43  ;;  %v560_v45 = vpop.f32.mrb[1].mxu0 }
  0xe1   :  { %v111_v46 = vmax.f32 %v108_v44, 0.0 }
  0xe3   :  { %594 = vmatmul.mubr.f32.vlgmr.msra.gmra.mrb[0].mxu1 %v111_v46 }
  0xe4   :  { %666 = vmatprep.mubr.msk.f32.mxu1 %vm776_vm0, %v777_v6  ;;  %725 = vmatpush3.bf16.msra.mxu1 %v724_v7 }
  0xe5   :  { %726 = vmatprep.subr.bf16.mxu1 %v775_v3 }
 0x1b6   :  { %v199_v53 = vpop.f32.mrb[0].mxu1 }
 0x1b7   :  { %v200_v54 = vadd.f32 %v487_v50, %v199_v53  ;;  %v595_v55 = vpop.f32.mrb[1].mxu1 }
 0x1b9   :  { %v203_v57 = vmax.f32 %v200_v54, 0.0 }
 0x1bb   :  { %613 = vmatmul.mubr.msk.f32.vlgmr.msra.gmra.mrb[2].mxu0 %vm217_vm2, %v203_v57 }
 0x1bc   :  { %713 = vmatpush3.bf16.msra.mxu0 %v712_v56  ;;  %631 = vmatprep.mubr.msk.f32.mxu0 %vm776_vm0, %v777_v6  ;;  %v381_v6 = vld [vmem:[%s1050_s5 + $0x10] sm:$0xff]  ;;  %s751_s5 = scalar_lea.vmem %s478_s11, 128 }
 0x1bd   :  { %714 = vmatprep.subr.bf16.mxu0 %v775_v3  ;;  %v727_v9 = vpack.c.bf16 %v382_v8, %v381_v6  ;;  %p752_p0 = scmp.ne.s32.totalorder %s478_s11, %s751_s5  ;;  %p757_p2 = scmp.lt.s32.totalorder %s751_s5, %s751_s5 }
 0x1bf   :  { %728 = vmatpush3.bf16.msra.mxu1 %v727_v9  ;;  %p758_p3 = por %p757_p2, %p756_p1 }
 0x1c0   :  { %716 = vmatpush3.bf16.msra.mxu0 %v715_v60  ;;  %729 = vmatprep.subr.bf16.mxu1 %v775_v3 }
 0x1c1   :  { %717 = vmatprep.subr.bf16.mxu0 %v775_v3  ;;  %p759_p4 = pnand %p758_p3, %p752_p0 }
 0x1c3   :  { %731 = vmatpush3.bf16.msra.mxu1 %v730_v12 }
 0x1c4   :  { %719 = vmatpush3.bf16.msra.mxu0 %v718_v63  ;;  %732 = vmatprep.subr.bf16.mxu1 %v775_v3 }
 0x1c5   :  { %720 = vmatprep.subr.bf16.mxu0 %v775_v3 }
 0x1c7   :  { %734 = vmatpush3.bf16.msra.mxu1 %v733_v15 }
 0x1c8   :  { %722 = vmatpush3.bf16.msra.mxu0 %v721_v2  ;;  %735 = vmatprep.subr.bf16.mxu1 %v775_v3 }
 0x1cb   :  { %737 = vmatpush3.bf16.msra.mxu1 %v736_v18 }
 0x1cc   :  { %738 = vmatprep.subr.bf16.mxu1 %v775_v3 }
 0x1cf   :  { %740 = vmatpush3.bf16.msra.mxu1 %v739_v21 }
 0x1d0   :  { %741 = vmatprep.subr.bf16.mxu1 %v775_v3 }
 0x1d3   :  { %743 = vmatpush3.bf16.msra.mxu1 %v742_v24 }
 0x1d4   :  { %744 = vmatprep.subr.bf16.mxu1 %v775_v3  ;;  %v490_v3 = vld [vmem:[%s1051_s6 + $0x3] ss:$0 sm:$0xff] }
 0x1d7   :  { %746 = vmatpush3.bf16.msra.mxu1 %v745_v32 }
 0x28e   :  { %v287_v26 = vpop.f32.mrb[2].mxu0 }
 0x28f   :  { %v288_v27 = vadd.f32 %v488_v25, %v287_v26  ;;  %v614_v28 = vpop.f32.mrb[3].mxu0 }
 0x291   :  { %v291_v29 = vmax.f32 %v288_v27, 0.0 }
 0x293   :  { %632 = vmatmul.mubr.msk.f32.vlgmr.msra.gmra.mrb[4].mxu0 %vm217_vm2, %v291_v29 }
 0x366   :  { %v374_v33 = vpop.f32.mrb[4].mxu0 }
 0x367   :  { %v375_v34 = vadd.f32 %v490_v3, %v374_v33  ;;  %v633_v35 = vpop.f32.mrb[5].mxu0 }
 0x369   :  { %v378_v36 = vmax.f32 %v375_v34, 0.0 }
 0x36b   :  { %667 = vmatmul.mubr.f32.vlgmr.msra.gmra.mrb[2].mxu1 %v378_v36 }
 0x43e   :  { %v466_v38 = vpop.f32.mrb[2].mxu1 }
 0x43f   :  { %v467_v39 = vadd.f32 %v492_v37, %v466_v38  ;;  %v668_v40 = vpop.f32.mrb[3].mxu1 }
 0x441   :  { %470 = vst.msk [vmem:[#allocation2] sm:$0xff] %vm37_vm1, %v467_v39 }
 0x442   :  { %762 = shalt.err (!%p759_p4)
}
 0x443   :  { %s763_s14 = scalar_lea.hbm %s1052_s7, 128 }
 0x444   :  { %p764_p5 = scmp.ne.s32.totalorder %s1052_s7, %s763_s14  ;;  %p767_p6 = scmp.lt.u32.totalorder %s763_s14, %s1052_s7 }
 0x446   :  { %p769_p7 = pnand %p767_p6, %p764_p5 }
 0x448   :  { %772 = shalt.err (!%p769_p7)
}
 0x449   :  { %480 = dma.vmem_to_hbm [thread:$0]  %s478_s11, 128, %s1052_s7, [#allocation3]  }
 0x44a   :  { %773 = dma.done.wait [#allocation3], 128  }
 0x44b   :  { %774 = vsyncadd [#allocation3], 4294967168 }
 0x44c   :  { %484 = vsyncpa [#allocation3], 1 }

</bundles_post_ra>
